<compile_context>
chip_gen: v5e
topology: v5e:2x2
jax: 0.10.0
libtpu: 0.0.40
codegen_flags: <defaults>
</compile_context>

<pallas_src>
import functools

import jax
import jax.numpy as jnp
from jax.experimental import pallas as pl
from jax.experimental.pallas import tpu as pltpu

_QMAX = 255.0                    # 8-bit asymmetric activation range [0, 255]
_LN_EPS = 1e-12                  # BitNetConfig.layer_norm_eps
_VMEM_LIMIT = 64 * 1024 * 1024   # fits v7x physical VMEM, lifts v5e's 16 MiB scoped default


# ---------------------------------------------------------------------------
# Pass 1: act-in fake-quant + quantized linear + per-tile (row-reduced) min/max stats
# ---------------------------------------------------------------------------
def _linear_kernel(x_ref, wT_ref, qin_ref, swb_ref, b_ref, out_ref, mn_ref, mx_ref):
    # qin_ref (SMEM, (3,)): [inv_scale, zero_point, bypass_flag]
    inv_scale = qin_ref[0]
    zp = qin_ref[1]
    bypass = qin_ref[2] > 0.5

    x = x_ref[...].astype(jnp.float32)                       # upcast in-register
    # Non-negative 8-bit levels; the "- zero_point" is folded into the bias in the wrapper
    # (b_eff = bias - swb * zp * colsum(w_int)), saving one VPU op per element.
    xi = jnp.clip(jnp.round(x * inv_scale + zp), 0.0, _QMAX)
    # Bypass branch (degenerate act range) keeps raw activations; bf16 cast only lossy there.
    x_vals = jnp.where(bypass, x, xi)

    # MXU matmul in bf16 (exact small integers), f32 accumulate; weight resident as (I, H).
    acc = jnp.dot(x_vals.astype(jnp.bfloat16), wT_ref[...],
                  preferred_element_type=jnp.float32)         # (TM, H)

    out = acc * swb_ref[...] + b_ref[...]                     # folded act/weight scales + bias
    out_ref[...] = out.astype(out_ref.dtype)

    # Partial (row-reduced) stats for the global act-out observer; final reduce in wrapper.
    mn_ref[...] = jnp.min(out, axis=0, keepdims=True)
    mx_ref[...] = jnp.max(out, axis=0, keepdims=True)


# ---------------------------------------------------------------------------
# Pass 2: act-out fake-quant + (dropout=identity) + residual + LayerNorm
# ---------------------------------------------------------------------------
def _quant_ln_kernel(y_ref, res_ref, qout_ref, g_ref, beta_ref, o_ref):
    # qout_ref (SMEM, (4,)): [inv_scale, zero_point, bypass_flag, scale]
    inv_scale = qout_ref[0]
    zp = qout_ref[1]
    bypass = qout_ref[2] > 0.5
    scale = qout_ref[3]

    y = y_ref[...].astype(jnp.float32)
    yq = (jnp.clip(jnp.round(y * inv_scale + zp), 0.0, _QMAX) - zp) * scale
    y = jnp.where(bypass, y, yq)

    # TODO(synk): nn.Dropout(p=0.1) training-mode stochastic masking not reproduced (identity).

    h = y + res_ref[...].astype(jnp.float32)
    mean = jnp.mean(h, axis=-1, keepdims=True)
    var = jnp.mean((h - mean) ** 2, axis=-1, keepdims=True)
    o = (h - mean) * jax.lax.rsqrt(var + _LN_EPS) * g_ref[...] + beta_ref[...]
    o_ref[...] = o.astype(o_ref.dtype)


# ---------------------------------------------------------------------------
# pipeline_mode=pl.Buffered(1) feature probe (single-buffer grid-invariant operands);
# falls back to default double-buffering on JAX versions without support.
# ---------------------------------------------------------------------------
def _probe_kernel(x_ref, o_ref):
    o_ref[...] = x_ref[...]


def _single_buffer_kwargs():
    try:
        fn = pl.pallas_call(
            _probe_kernel,
            grid=(1,),
            in_specs=[pl.BlockSpec((8, 128), lambda i: (0, 0),
                                   pipeline_mode=pl.Buffered(1))],
            out_specs=pl.BlockSpec((8, 128), lambda i: (0, 0)),
            out_shape=jax.ShapeDtypeStruct((8, 128), jnp.float32),
        )
        jax.block_until_ready(fn(jnp.zeros((8, 128), jnp.float32)))
        return {"pipeline_mode": pl.Buffered(1)}
    except Exception:
        return {}


_RESIDENT_KW = _single_buffer_kwargs()


def _resident_spec(block_shape, index_map):
    """BlockSpec for a grid-invariant operand (single-buffered when supported)."""
    return pl.BlockSpec(block_shape, index_map, **_RESIDENT_KW)


# ---------------------------------------------------------------------------
# Host-side helpers
# ---------------------------------------------------------------------------
def _round_up(n, m):
    return ((n + m - 1) // m) * m


def _choose_tiles(T):
    """Returns (padded token count, pass-1 token tile, pass-2 token tile)."""
    if T <= 512:
        tp = _round_up(max(T, 8), 8)
        return tp, tp, tp
    tp = _round_up(T, 512)
    g = tp // 512
    tm2 = 1024 if g % 2 == 0 else 512   # pass 2 is HBM-bound and has no resident weight
    return tp, 512, tm2


def _act_quant_params(mn, mx):
    """Global asymmetric 8-bit observer -> (scale, inv_scale, zero_point, bypass_flag)."""
    mn = mn.astype(jnp.float32)
    mx = mx.astype(jnp.float32)
    rng = mx - mn
    bypass = rng < 1e-8
    scale_raw = rng / _QMAX
    safe = jnp.maximum(scale_raw, 1e-30)          # guard the discarded branch (no inf/NaN)
    zp = jnp.clip(jnp.round(-mn / safe), 0.0, _QMAX)
    scale = jnp.where(bypass, 1.0, scale_raw)
    inv_scale = jnp.where(bypass, 1.0, 1.0 / safe)
    flag = bypass.astype(jnp.float32)
    return scale, inv_scale, zp, flag


@functools.partial(jax.jit, static_argnames=("block_tokens",))
def bit_bert_output(hidden_states, input_tensor, weight, bias, gamma, beta,
                    *, block_tokens=None):
    """hidden_states: (B, S, I), input_tensor: (B, S, H), weight: (H, I) -> (B, S, H)."""
    B, S, I = hidden_states.shape
    H = input_tensor.shape[-1]
    T = B * S
    io_dtype = jnp.promote_types(hidden_states.dtype, input_tensor.dtype)
    io_bytes = jnp.dtype(io_dtype).itemsize
    x_bytes = jnp.dtype(hidden_states.dtype).itemsize
    r_bytes = jnp.dtype(input_tensor.dtype).itemsize

    # Native-dtype streams: no wrapper f32 copies of the big activations / residual.
    x2d = hidden_states.reshape(T, I)
    r2d = input_tensor.reshape(T, H)

    # ---- weight fake-quant: hoisted (token-independent), done once, pre-transposed ----
    w = weight.astype(jnp.float32)                                    # (H, I)
    rng_w = jnp.maximum(jnp.abs(jnp.min(w, axis=1, keepdims=True)),
                        jnp.abs(jnp.max(w, axis=1, keepdims=True)))
    sw = jnp.maximum(rng_w / 127.0, 1e-8)                             # (H, 1) per-row scale
    w_int = jnp.clip(jnp.round(w / sw), -128.0, 127.0)                # exact small integers
    wT_bf16 = w_int.T.astype(jnp.bfloat16)                            # (I, H), exact in bf16
    colsum = jnp.sum(w_int, axis=1)                                   # (H,) for zp folding

    # ---- act-in observer: global min/max on the native-dtype input (cheap XLA reduce) ----
    in_scale, in_inv, in_zp, in_flag = _act_quant_params(jnp.min(x2d), jnp.max(x2d))
    qin = jnp.stack([in_inv, in_zp, in_flag]).astype(jnp.float32)     # (3,) -> SMEM

    sw_vec = sw.reshape(-1)
    swb_vec = in_scale * sw_vec                                       # folded act-in * weight scale
    swb_row = swb_vec.reshape(1, H).astype(jnp.float32)
    # fold the activation zero-point into the bias:  bias - swb * zp * sum_i w_int
    b_eff = bias.astype(jnp.float32) - (1.0 - in_flag) * swb_vec * in_zp * colsum
    b_row = b_eff.reshape(1, H)
    g_row = gamma.reshape(1, H).astype(jnp.float32)
    beta_row = beta.reshape(1, H).astype(jnp.float32)

    # ---- token tiling (+ edge-replication padding so arbitrary T keeps the fast path) ----
    if block_tokens is not None:
        TM1 = TM2 = max(8, _round_up(int(block_tokens), 8))
        Tp = _round_up(T, TM1)
    else:
        Tp, TM1, TM2 = _choose_tiles(T)
    pad = Tp - T
    if pad:
        # duplicated rows produce duplicated outputs -> the act-out min/max observer is unaffected
        x2d = jnp.pad(x2d, ((0, pad), (0, 0)), mode="edge")
        r2d = jnp.pad(r2d, ((0, pad), (0, 0)), mode="edge")
    G1 = Tp // TM1
    G2 = Tp // TM2

    # ---- pass 1: quantized linear + per-tile stats ----
    out1, mn_t, mx_t = pl.pallas_call(
        _linear_kernel,
        grid=(G1,),
        in_specs=[
            pl.BlockSpec((TM1, I), lambda i: (i, 0)),                 # activation tile (native dtype)
            _resident_spec((I, H), lambda i: (0, 0)),                 # resident bf16 weight
            pl.BlockSpec(memory_space=pltpu.MemorySpace.SMEM),        # act-in quant scalars
            _resident_spec((1, H), lambda i: (0, 0)),                 # folded scales
            _resident_spec((1, H), lambda i: (0, 0)),                 # zp-folded bias
        ],
        out_specs=[
            pl.BlockSpec((TM1, H), lambda i: (i, 0)),                 # linear output
            pl.BlockSpec((None, 1, H), lambda i: (i, 0, 0)),          # per-tile row-min
            pl.BlockSpec((None, 1, H), lambda i: (i, 0, 0)),          # per-tile row-max
        ],
        out_shape=[
            jax.ShapeDtypeStruct((Tp, H), io_dtype),
            jax.ShapeDtypeStruct((G1, 1, H), jnp.float32),
            jax.ShapeDtypeStruct((G1, 1, H), jnp.float32),
        ],
        compiler_params=pltpu.CompilerParams(
            dimension_semantics=("parallel",),
            vmem_limit_bytes=_VMEM_LIMIT),
        cost_estimate=pl.CostEstimate(
            flops=2 * Tp * I * H, transcendentals=0,
            bytes_accessed=int(Tp * I * x_bytes + 2 * I * H + Tp * H * io_bytes
                               + 8 * G1 * H + 12 * H)),
    )(x2d, wT_bf16, qin, swb_row, b_row)

    # ---- act-out observer: finish the min/max reduction over the tiny per-tile stats ----
    out_scale, out_inv, out_zp, out_flag = _act_quant_params(jnp.min(mn_t), jnp.max(mx_t))
    qout = jnp.stack([out_inv, out_zp, out_flag, out_scale]).astype(jnp.float32)  # (4,) -> SMEM

    # ---- pass 2: act-out fake-quant + residual + LayerNorm (aliased onto out1) ----
    out2d = pl.pallas_call(
        _quant_ln_kernel,
        grid=(G2,),
        in_specs=[
            pl.BlockSpec((TM2, H), lambda i: (i, 0)),                 # linear output tile
            pl.BlockSpec((TM2, H), lambda i: (i, 0)),                 # residual tile (native dtype)
            pl.BlockSpec(memory_space=pltpu.MemorySpace.SMEM),        # act-out quant scalars
            _resident_spec((1, H), lambda i: (0, 0)),                 # LN gamma
            _resident_spec((1, H), lambda i: (0, 0)),                 # LN beta
        ],
        out_specs=pl.BlockSpec((TM2, H), lambda i: (i, 0)),
        out_shape=jax.ShapeDtypeStruct((Tp, H), io_dtype),
        compiler_params=pltpu.CompilerParams(
            dimension_semantics=("parallel",),
            vmem_limit_bytes=_VMEM_LIMIT),
        input_output_aliases={0: 0},                                  # reuse the out1 buffer
        cost_estimate=pl.CostEstimate(
            flops=14 * Tp * H, transcendentals=Tp,
            bytes_accessed=int(Tp * H * (2 * io_bytes + r_bytes) + 8 * H)),
    )(out1, r2d, qout, g_row, beta_row)

    return out2d[:T].reshape(B, S, H)


# ---------------------------------------------------------------------------
# Pure-JAX reference mirroring the PyTorch module
# ---------------------------------------------------------------------------
def _reference(hidden_states, input_tensor, weight, bias, gamma, beta):
    x = hidden_states.astype(jnp.float32)
    mn, mx = jnp.min(x), jnp.max(x)
    scale = (mx - mn) / 255.0
    zp = jnp.clip(jnp.round(-mn / jnp.maximum(scale, 1e-30)), 0.0, 255.0)
    xq = jnp.where(mx - mn < 1e-8, x,
                   (jnp.clip(jnp.round(x / scale + zp), 0.0, 255.0) - zp) * scale)
    w = weight.astype(jnp.float32)
    rng = jnp.maximum(jnp.abs(jnp.min(w, 1, keepdims=True)),
                      jnp.abs(jnp.max(w, 1, keepdims=True)))
    s = jnp.maximum(rng / 127.0, 1e-8)
    wq = jnp.clip(jnp.round(w / s), -128.0, 127.0) * s
    out = jnp.matmul(xq, wq.T, precision=jax.lax.Precision.HIGHEST) + bias
    mn2, mx2 = jnp.min(out), jnp.max(out)
    scale2 = (mx2 - mn2) / 255.0
    zp2 = jnp.clip(jnp.round(-mn2 / jnp.maximum(scale2, 1e-30)), 0.0, 255.0)
    out = jnp.where(mx2 - mn2 < 1e-8, out,
                    (jnp.clip(jnp.round(out / scale2 + zp2), 0.0, 255.0) - zp2) * scale2)
    h = out + input_tensor.astype(jnp.float32)
    mean = jnp.mean(h, -1, keepdims=True)
    var = jnp.mean((h - mean) ** 2, -1, keepdims=True)
    return (h - mean) / jnp.sqrt(var + 1e-12) * gamma + beta


if __name__ == "__main__":
    # Small config consistent with BitBertOutput: intermediate -> hidden
    B, S, HIDDEN, INTERMEDIATE = 2, 8, 32, 128

    key = jax.random.PRNGKey(0)
    k1, k2, k3 = jax.random.split(key, 3)

    hidden_states = jax.random.normal(k1, (B, S, INTERMEDIATE), dtype=jnp.float32)
    input_tensor = jax.random.normal(k2, (B, S, HIDDEN), dtype=jnp.float32)

    weight = 0.02 * jax.random.normal(k3, (HIDDEN, INTERMEDIATE), dtype=jnp.float32)  # (out, in)
    bias = jnp.zeros((HIDDEN,), dtype=jnp.float32)
    gamma = jnp.ones((HIDDEN,), dtype=jnp.float32)    # LayerNorm weight
    beta = jnp.zeros((HIDDEN,), dtype=jnp.float32)    # LayerNorm bias

    # block_tokens=8 forces a multi-tile grid (G=2) even at this toy size, exercising the
    # tiled pipeline and the cross-tile act-out observer reduction.
    out = bit_bert_output(hidden_states, input_tensor, weight, bias, gamma, beta,
                          block_tokens=8)
    out = jax.block_until_ready(out)
    assert out.shape == (B, S, HIDDEN)

    ref = _reference(hidden_states, input_tensor, weight, bias, gamma, beta)
    err = jnp.abs(out - ref)
    # Float re-association at an 8-bit fake-quant rounding boundary can legitimately shift an
    # isolated element by one quant step (~(max-min)/255); require tight aggregate agreement
    # and a worst case bounded below one quant step propagated through the LayerNorm.
    mean_err = float(jnp.mean(err))
    max_err = float(jnp.max(err))
    assert mean_err < 1e-4, f"mean abs err too large: {mean_err}"
    assert max_err < 1e-2, f"max abs err too large: {max_err}"

    # Token count not divisible by the tile exercises the edge-replication padding path.
    hs2 = hidden_states[:1, :5]
    it2 = input_tensor[:1, :5]
    out_pad = bit_bert_output(hs2, it2, weight, bias, gamma, beta)
    out_pad = jax.block_until_ready(out_pad)
    assert out_pad.shape == (1, 5, HIDDEN)
    ref_pad = _reference(hs2, it2, weight, bias, gamma, beta)
    err2 = jnp.abs(out_pad - ref_pad)
    assert float(jnp.mean(err2)) < 1e-4, f"padded mean abs err too large: {float(jnp.mean(err2))}"
    assert float(jnp.max(err2)) < 1e-2, f"padded max abs err too large: {float(jnp.max(err2))}"

    print("KERNEL_OK")
</pallas_src>

<mosaic_0001>
module attributes {stable_mosaic.version = 11 : i64} {
  func.func @_probe_kernel(%arg0: i32, %arg1: memref<8x128xf32, #tpu.memory_space<vmem>>, %arg2: memref<8x128xf32, #tpu.memory_space<vmem>>) attributes {dimension_semantics = [#tpu.dimension_semantics<arbitrary>], iteration_bounds = array<i64: 1>, scalar_prefetch = 0 : i64, scratch_operands = 0 : i64, tpu.core_type = #tpu.core_type<tc>, window_params = [{pipeline_mode = #tpu.pipeline_mode<synchronous>, transform_indices = @transform_0, window_bounds = array<i64: 8, 128>}, {pipeline_mode = #tpu.pipeline_mode<synchronous>, transform_indices = @transform_1, window_bounds = array<i64: 8, 128>}]} {
    %c0 = arith.constant 0 : index
    %c0_0 = arith.constant 0 : index
    %0 = vector.load %arg1[%c0, %c0_0] : memref<8x128xf32, #tpu.memory_space<vmem>>, vector<8x128xf32>
    %c0_1 = arith.constant 0 : index
    %c0_2 = arith.constant 0 : index
    %1 = vector.load %arg2[%c0_1, %c0_2] : memref<8x128xf32, #tpu.memory_space<vmem>>, vector<8x128xf32>
    tpu.vector_store %arg2[%c0_1, %c0_2], %0 {strides = array<i32>} : memref<8x128xf32, #tpu.memory_space<vmem>>, vector<8x128xf32>,
    return
  }
  func.func @transform_0(%arg0: i32) -> (i32, i32) {
    %c0_i32 = arith.constant 0 : i32
    %c0_i32_0 = arith.constant 0 : i32
    %c0_i32_1 = arith.constant 0 : i32
    return %c0_i32, %c0_i32_0 : i32, i32
  }
  func.func @transform_1(%arg0: i32) -> (i32, i32) {
    %c0_i32 = arith.constant 0 : i32
    %c0_i32_0 = arith.constant 0 : i32
    %c0_i32_1 = arith.constant 0 : i32
    return %c0_i32, %c0_i32_0 : i32, i32
  }
}

module attributes {stable_mosaic.version = 11 : i64} {
  func.func @_linear_kernel(%arg0: i32, %arg1: memref<8x128xf32, #tpu.memory_space<vmem>>, %arg2: memref<128x32xbf16, #tpu.memory_space<vmem>>, %arg3: memref<3xf32, #tpu.memory_space<smem>>, %arg4: memref<1x32xf32, #tpu.memory_space<vmem>>, %arg5: memref<1x32xf32, #tpu.memory_space<vmem>>, %arg6: memref<8x32xf32, #tpu.memory_space<vmem>>, %arg7: memref<1x1x32xf32, #tpu.memory_space<vmem>>, %arg8: memref<1x1x32xf32, #tpu.memory_space<vmem>>) attributes {dimension_semantics = [#tpu.dimension_semantics<parallel>], iteration_bounds = array<i64: 2>, scalar_prefetch = 0 : i64, scratch_operands = 0 : i64, tpu.core_type = #tpu.core_type<tc>, window_params = [{transform_indices = @transform_0, window_bounds = array<i64: 8, 128>}, {pipeline_mode = #tpu.pipeline_mode<synchronous>, transform_indices = @transform_1, window_bounds = array<i64: 128, 32>}, {transform_indices = @transform_2, window_bounds = array<i64: 3>}, {pipeline_mode = #tpu.pipeline_mode<synchronous>, transform_indices = @transform_3, window_bounds = array<i64: 1, 32>}, {pipeline_mode = #tpu.pipeline_mode<synchronous>, transform_indices = @transform_4, window_bounds = array<i64: 1, 32>}, {transform_indices = @transform_5, window_bounds = array<i64: 8, 32>}, {transform_indices = @transform_6, window_bounds = array<i64: 1, 1, 32>}, {transform_indices = @transform_7, window_bounds = array<i64: 1, 1, 32>}]} {
    %c0 = arith.constant 0 : index
    %0 = memref.load %arg3[%c0] : memref<3xf32, #tpu.memory_space<smem>>
    %c1 = arith.constant 1 : index
    %1 = memref.load %arg3[%c1] : memref<3xf32, #tpu.memory_space<smem>>
    %c2 = arith.constant 2 : index
    %2 = memref.load %arg3[%c2] : memref<3xf32, #tpu.memory_space<smem>>
    %cst = arith.constant 5.000000e-01 : f32
    %3 = arith.cmpf ogt, %2, %cst : f32
    %c0_0 = arith.constant 0 : index
    %c0_1 = arith.constant 0 : index
    %4 = vector.load %arg1[%c0_0, %c0_1] : memref<8x128xf32, #tpu.memory_space<vmem>>, vector<8x128xf32>
    %5 = vector.broadcast %0 : f32 to vector<8x128xf32>
    %6 = arith.mulf %4, %5 : vector<8x128xf32>
    %7 = vector.broadcast %1 : f32 to vector<8x128xf32>
    %8 = arith.addf %6, %7 : vector<8x128xf32>
    %9 = math.roundeven %8 : vector<8x128xf32>
    %cst_2 = arith.constant 0.000000e+00 : f32
    %cst_3 = arith.constant 2.550000e+02 : f32
    %10 = vector.broadcast %cst_2 : f32 to vector<8x128xf32>
    %11 = arith.maximumf %10, %9 : vector<8x128xf32>
    %12 = vector.broadcast %cst_3 : f32 to vector<8x128xf32>
    %13 = arith.minimumf %12, %11 : vector<8x128xf32>
    %14 = arith.select %3, %4, %13 : vector<8x128xf32>
    %15 = arith.truncf %14 : vector<8x128xf32> to vector<8x128xbf16>
    %c0_4 = arith.constant 0 : index
    %c0_5 = arith.constant 0 : index
    %16 = vector.load %arg2[%c0_4, %c0_5] : memref<128x32xbf16, #tpu.memory_space<vmem>>, vector<128x32xbf16>
    %cst_6 = arith.constant dense<0.000000e+00> : vector<8x32xf32>
    %17 = tpu.matmul %15, %16, %cst_6 {dimension_numbers = #tpu.dot_dimension_numbers<[1], [0], [0], [1], [0, 0, 1, 1], [], []>} : vector<8x128xbf16>, vector<128x32xbf16>, vector<8x32xf32> -> vector<8x32xf32>
    %c0_7 = arith.constant 0 : index
    %c0_8 = arith.constant 0 : index
    %18 = vector.load %arg4[%c0_7, %c0_8] : memref<1x32xf32, #tpu.memory_space<vmem>>, vector<1x32xf32>
    %19 = vector.broadcast %18 : vector<1x32xf32> to vector<8x32xf32>
    %20 = arith.mulf %17, %19 : vector<8x32xf32>
    %c0_9 = arith.constant 0 : index
    %c0_10 = arith.constant 0 : index
    %21 = vector.load %arg5[%c0_9, %c0_10] : memref<1x32xf32, #tpu.memory_space<vmem>>, vector<1x32xf32>
    %22 = vector.broadcast %21 : vector<1x32xf32> to vector<8x32xf32>
    %23 = arith.addf %20, %22 : vector<8x32xf32>
    %c0_11 = arith.constant 0 : index
    %c0_12 = arith.constant 0 : index
    %24 = vector.load %arg6[%c0_11, %c0_12] : memref<8x32xf32, #tpu.memory_space<vmem>>, vector<8x32xf32>
    tpu.vector_store %arg6[%c0_11, %c0_12], %23 {strides = array<i32>} : memref<8x32xf32, #tpu.memory_space<vmem>>, vector<8x32xf32>,
    %cst_13 = arith.constant dense<0x7F800000> : vector<32xf32>
    %25 = vector.multi_reduction <minimumf>, %23, %cst_13 [0] : vector<8x32xf32> to vector<32xf32>
    %26 = vector.shape_cast %25 : vector<32xf32> to vector<1x32xf32>
    %c0_14 = arith.constant 0 : index
    %c0_15 = arith.constant 0 : index
    %c0_16 = arith.constant 0 : index
    %27 = vector.load %arg7[%c0_14, %c0_15, %c0_16] : memref<1x1x32xf32, #tpu.memory_space<vmem>>, vector<1x1x32xf32>
    %28 = vector.shape_cast %27 : vector<1x1x32xf32> to vector<1x32xf32>
    %29 = vector.shape_cast %26 : vector<1x32xf32> to vector<1x1x32xf32>
    tpu.vector_store %arg7[%c0_14, %c0_15, %c0_16], %29 {strides = array<i32>} : memref<1x1x32xf32, #tpu.memory_space<vmem>>, vector<1x1x32xf32>,
    %cst_17 = arith.constant dense<0xFF800000> : vector<32xf32>
    %30 = vector.multi_reduction <maximumf>, %23, %cst_17 [0] : vector<8x32xf32> to vector<32xf32>
    %31 = vector.shape_cast %30 : vector<32xf32> to vector<1x32xf32>
    %c0_18 = arith.constant 0 : index
    %c0_19 = arith.constant 0 : index
    %c0_20 = arith.constant 0 : index
    %32 = vector.load %arg8[%c0_18, %c0_19, %c0_20] : memref<1x1x32xf32, #tpu.memory_space<vmem>>, vector<1x1x32xf32>
    %33 = vector.shape_cast %32 : vector<1x1x32xf32> to vector<1x32xf32>
    %34 = vector.shape_cast %31 : vector<1x32xf32> to vector<1x1x32xf32>
    tpu.vector_store %arg8[%c0_18, %c0_19, %c0_20], %34 {strides = array<i32>} : memref<1x1x32xf32, #tpu.memory_space<vmem>>, vector<1x1x32xf32>,
    return
  }
  func.func @transform_0(%arg0: i32) -> (i32, i32) {
    %c0_i32 = arith.constant 0 : i32
    %c0_i32_0 = arith.constant 0 : i32
    return %arg0, %c0_i32 : i32, i32
  }
  func.func @transform_1(%arg0: i32) -> (i32, i32) {
    %c0_i32 = arith.constant 0 : i32
    %c0_i32_0 = arith.constant 0 : i32
    %c0_i32_1 = arith.constant 0 : i32
    return %c0_i32, %c0_i32_0 : i32, i32
  }
  func.func @transform_2(%arg0: i32) -> i32 {
    %c0_i32 = arith.constant 0 : i32
    %c0_i32_0 = arith.constant 0 : i32
    return %c0_i32 : i32
  }
  func.func @transform_3(%arg0: i32) -> (i32, i32) {
    %c0_i32 = arith.constant 0 : i32
    %c0_i32_0 = arith.constant 0 : i32
    %c0_i32_1 = arith.constant 0 : i32
    return %c0_i32, %c0_i32_0 : i32, i32
  }
  func.func @transform_4(%arg0: i32) -> (i32, i32) {
    %c0_i32 = arith.constant 0 : i32
    %c0_i32_0 = arith.constant 0 : i32
    %c0_i32_1 = arith.constant 0 : i32
    return %c0_i32, %c0_i32_0 : i32, i32
  }
  func.func @transform_5(%arg0: i32) -> (i32, i32) {
    %c0_i32 = arith.constant 0 : i32
    %c0_i32_0 = arith.constant 0 : i32
    return %arg0, %c0_i32 : i32, i32
  }
  func.func @transform_6(%arg0: i32) -> (i32, i32, i32) {
    %c0_i32 = arith.constant 0 : i32
    %c0_i32_0 = arith.constant 0 : i32
    %c0_i32_1 = arith.constant 0 : i32
    return %arg0, %c0_i32, %c0_i32_0 : i32, i32, i32
  }
  func.func @transform_7(%arg0: i32) -> (i32, i32, i32) {
    %c0_i32 = arith.constant 0 : i32
    %c0_i32_0 = arith.constant 0 : i32
    %c0_i32_1 = arith.constant 0 : i32
    return %arg0, %c0_i32, %c0_i32_0 : i32, i32, i32
  }
}

module attributes {stable_mosaic.version = 11 : i64} {
  func.func @_quant_ln_kernel(%arg0: i32, %arg1: memref<8x32xf32, #tpu.memory_space<vmem>>, %arg2: memref<8x32xf32, #tpu.memory_space<vmem>>, %arg3: memref<4xf32, #tpu.memory_space<smem>>, %arg4: memref<1x32xf32, #tpu.memory_space<vmem>>, %arg5: memref<1x32xf32, #tpu.memory_space<vmem>>, %arg6: memref<8x32xf32, #tpu.memory_space<vmem>>) attributes {dimension_semantics = [#tpu.dimension_semantics<parallel>], iteration_bounds = array<i64: 2>, scalar_prefetch = 0 : i64, scratch_operands = 0 : i64, tpu.core_type = #tpu.core_type<tc>, window_params = [{transform_indices = @transform_0, window_bounds = array<i64: 8, 32>}, {transform_indices = @transform_1, window_bounds = array<i64: 8, 32>}, {transform_indices = @transform_2, window_bounds = array<i64: 4>}, {pipeline_mode = #tpu.pipeline_mode<synchronous>, transform_indices = @transform_3, window_bounds = array<i64: 1, 32>}, {pipeline_mode = #tpu.pipeline_mode<synchronous>, transform_indices = @transform_4, window_bounds = array<i64: 1, 32>}, {transform_indices = @transform_5, window_bounds = array<i64: 8, 32>}]} {
    %c0 = arith.constant 0 : index
    %0 = memref.load %arg3[%c0] : memref<4xf32, #tpu.memory_space<smem>>
    %c1 = arith.constant 1 : index
    %1 = memref.load %arg3[%c1] : memref<4xf32, #tpu.memory_space<smem>>
    %c2 = arith.constant 2 : index
    %2 = memref.load %arg3[%c2] : memref<4xf32, #tpu.memory_space<smem>>
    %cst = arith.constant 5.000000e-01 : f32
    %3 = arith.cmpf ogt, %2, %cst : f32
    %c3 = arith.constant 3 : index
    %4 = memref.load %arg3[%c3] : memref<4xf32, #tpu.memory_space<smem>>
    %c0_0 = arith.constant 0 : index
    %c0_1 = arith.constant 0 : index
    %5 = vector.load %arg1[%c0_0, %c0_1] : memref<8x32xf32, #tpu.memory_space<vmem>>, vector<8x32xf32>
    %6 = vector.broadcast %0 : f32 to vector<8x32xf32>
    %7 = arith.mulf %5, %6 : vector<8x32xf32>
    %8 = vector.broadcast %1 : f32 to vector<8x32xf32>
    %9 = arith.addf %7, %8 : vector<8x32xf32>
    %10 = math.roundeven %9 : vector<8x32xf32>
    %cst_2 = arith.constant 0.000000e+00 : f32
    %cst_3 = arith.constant 2.550000e+02 : f32
    %11 = vector.broadcast %cst_2 : f32 to vector<8x32xf32>
    %12 = arith.maximumf %11, %10 : vector<8x32xf32>
    %13 = vector.broadcast %cst_3 : f32 to vector<8x32xf32>
    %14 = arith.minimumf %13, %12 : vector<8x32xf32>
    %15 = vector.broadcast %1 : f32 to vector<8x32xf32>
    %16 = arith.subf %14, %15 : vector<8x32xf32>
    %17 = vector.broadcast %4 : f32 to vector<8x32xf32>
    %18 = arith.mulf %16, %17 : vector<8x32xf32>
    %19 = arith.select %3, %5, %18 : vector<8x32xf32>
    %c0_4 = arith.constant 0 : index
    %c0_5 = arith.constant 0 : index
    %20 = vector.load %arg2[%c0_4, %c0_5] : memref<8x32xf32, #tpu.memory_space<vmem>>, vector<8x32xf32>
    %21 = arith.addf %19, %20 : vector<8x32xf32>
    %cst_6 = arith.constant dense<0.000000e+00> : vector<8xf32>
    %22 = vector.multi_reduction <add>, %21, %cst_6 [1] : vector<8x32xf32> to vector<8xf32>
    %23 = vector.shape_cast %22 : vector<8xf32> to vector<8x1xf32>
    %cst_7 = arith.constant 3.200000e+01 : f32
    %24 = vector.broadcast %cst_7 : f32 to vector<8x1xf32>
    %25 = arith.divf %23, %24 : vector<8x1xf32>
    %26 = vector.broadcast %25 : vector<8x1xf32> to vector<8x32xf32>
    %27 = arith.subf %21, %26 : vector<8x32xf32>
    %28 = arith.mulf %27, %27 : vector<8x32xf32>
    %cst_8 = arith.constant dense<0.000000e+00> : vector<8xf32>
    %29 = vector.multi_reduction <add>, %28, %cst_8 [1] : vector<8x32xf32> to vector<8xf32>
    %30 = vector.shape_cast %29 : vector<8xf32> to vector<8x1xf32>
    %cst_9 = arith.constant 3.200000e+01 : f32
    %31 = vector.broadcast %cst_9 : f32 to vector<8x1xf32>
    %32 = arith.divf %30, %31 : vector<8x1xf32>
    %33 = vector.broadcast %25 : vector<8x1xf32> to vector<8x32xf32>
    %34 = arith.subf %21, %33 : vector<8x32xf32>
    %cst_10 = arith.constant 9.99999996E-13 : f32
    %35 = vector.broadcast %cst_10 : f32 to vector<8x1xf32>
    %36 = arith.addf %32, %35 : vector<8x1xf32>
    %37 = math.rsqrt %36 : vector<8x1xf32>
    %38 = vector.broadcast %37 : vector<8x1xf32> to vector<8x32xf32>
    %39 = arith.mulf %34, %38 : vector<8x32xf32>
    %c0_11 = arith.constant 0 : index
    %c0_12 = arith.constant 0 : index
    %40 = vector.load %arg4[%c0_11, %c0_12] : memref<1x32xf32, #tpu.memory_space<vmem>>, vector<1x32xf32>
    %41 = vector.broadcast %40 : vector<1x32xf32> to vector<8x32xf32>
    %42 = arith.mulf %39, %41 : vector<8x32xf32>
    %c0_13 = arith.constant 0 : index
    %c0_14 = arith.constant 0 : index
    %43 = vector.load %arg5[%c0_13, %c0_14] : memref<1x32xf32, #tpu.memory_space<vmem>>, vector<1x32xf32>
    %44 = vector.broadcast %43 : vector<1x32xf32> to vector<8x32xf32>
    %45 = arith.addf %42, %44 : vector<8x32xf32>
    %c0_15 = arith.constant 0 : index
    %c0_16 = arith.constant 0 : index
    %46 = vector.load %arg6[%c0_15, %c0_16] : memref<8x32xf32, #tpu.memory_space<vmem>>, vector<8x32xf32>
    tpu.vector_store %arg6[%c0_15, %c0_16], %45 {strides = array<i32>} : memref<8x32xf32, #tpu.memory_space<vmem>>, vector<8x32xf32>,
    return
  }
  func.func @transform_0(%arg0: i32) -> (i32, i32) {
    %c0_i32 = arith.constant 0 : i32
    %c0_i32_0 = arith.constant 0 : i32
    return %arg0, %c0_i32 : i32, i32
  }
  func.func @transform_1(%arg0: i32) -> (i32, i32) {
    %c0_i32 = arith.constant 0 : i32
    %c0_i32_0 = arith.constant 0 : i32
    return %arg0, %c0_i32 : i32, i32
  }
  func.func @transform_2(%arg0: i32) -> i32 {
    %c0_i32 = arith.constant 0 : i32
    %c0_i32_0 = arith.constant 0 : i32
    return %c0_i32 : i32
  }
  func.func @transform_3(%arg0: i32) -> (i32, i32) {
    %c0_i32 = arith.constant 0 : i32
    %c0_i32_0 = arith.constant 0 : i32
    %c0_i32_1 = arith.constant 0 : i32
    return %c0_i32, %c0_i32_0 : i32, i32
  }
  func.func @transform_4(%arg0: i32) -> (i32, i32) {
    %c0_i32 = arith.constant 0 : i32
    %c0_i32_0 = arith.constant 0 : i32
    %c0_i32_1 = arith.constant 0 : i32
    return %c0_i32, %c0_i32_0 : i32, i32
  }
  func.func @transform_5(%arg0: i32) -> (i32, i32) {
    %c0_i32 = arith.constant 0 : i32
    %c0_i32_0 = arith.constant 0 : i32
    return %arg0, %c0_i32 : i32, i32
  }
}

</mosaic_0001>

<bundles_post_ra>
// kernel: tpu_custom_call.1
= control target key start
LH: loop header
LB: loop body
LE: loop exit
PB: predicated region body
PF: predicated region fallthrough
CT: control target
= control target key end

     0   :  { %6 = vsyncpa [#allocation3], 0  ;;  %s114_s0 = inlined_call_operand.hbm [shape: f32[8,128], index: 0, kind: input, shape index: {}]   ;;  %s115_s1 = inlined_call_operand.hbm [shape: f32[8,128], index: 1, kind: output, shape index: {}]  }
   0x1   :  { %7 = vsyncpa [#allocation4], 0  ;;  %s13_s8 = sshll.u32 %s114_s0, 4  ;;  %s96_s9 = smov [#allocation2]   ;;  %s14_s8 = int_to_ptr.hbm [resolvable:$true] %s13_s8 }
   0x2   :  { %s15_s10 = sshll.u32 %s96_s9, 4  ;;  %s16_s10 = int_to_ptr.vmem [resolvable:$true] %s15_s10 }
   0x3   :  { %18 = dma.hbm_to_vmem [thread:$0]  %s14_s8, 128, %s16_s10, [#allocation3]  }
   0x4   :  { %92 = dma.done.wait [#allocation3], 128  }
   0x5   :  { %93 = vsyncadd [#allocation3], 4294967168  ;;  %s97_s11 = smov [#allocation5]   ;;  %s32_s15 = sshll.u32 %s115_s1, 4  ;;  %v23_v0 = vld [vmem:[#allocation2] sm:$0xff]  ;;  %s33_s15 = int_to_ptr.hbm [resolvable:$true] %s32_s15 }
   0x6   :  { %s30_s12 = sshll.u32 %s97_s11, 4  ;;  %24 = vst [vmem:[#allocation5] sm:$0xff] %v23_v0  ;;  %s31_s12 = int_to_ptr.vmem [resolvable:$true] %s30_s12 }
   0x7   :  { %35 = dma.vmem_to_hbm [thread:$0]  %s31_s12, 128, %s33_s15, [#allocation4]  }
   0x8   :  { %94 = dma.done.wait [#allocation4], 128  }
   0x9   :  { %95 = vsyncadd [#allocation4], 4294967168 }
   0xa   :  { %40 = vsyncpa [#allocation3], 1 }
   0xb   :  { %41 = vsyncpa [#allocation4], 1 }

// kernel: bit_bert_output.3
= control target key start
LH: loop header
LB: loop body
LE: loop exit
PB: predicated region body
PF: predicated region fallthrough
CT: control target
= control target key end

     0   :  { %10 = vsyncpa [#allocation3], 0  ;;  %s499_s18 = smov 0   ;;  %s536_s0 = inlined_call_operand.vmem [shape: f32[16,32], index: 0, kind: input, shape index: {}, may-alias: {0,5}]   ;;  %s537_s1 = inlined_call_operand.vmem [shape: f32[16,32], index: 1, kind: input, shape index: {}]   ;;  %s538_s2 = inlined_call_operand.vmem [shape: f32[4], index: 2, kind: input, shape index: {}]   ;;  %s539_s3 = inlined_call_operand.vmem [shape: f32[1,32], index: 3, kind: input, shape index: {}]   ;;  %s540_s4 = inlined_call_operand.vmem [shape: f32[1,32], index: 4, kind: input, shape index: {}]   ;;  %s541_s5 = inlined_call_operand.vmem [shape: f32[16,32], index: 5, kind: output, shape index: {}, may-alias: {0,5}]  }
   0x1 LB: > { %s391_s19 = sadd.s32 4294967295, %s465_s18   ;;  %p393_p0 = scmp.ge.s32.totalorder %s465_s18, 1  ;;  %s465_s18 = sphi %s499_s18, %s16_s18  }
   0x2   : > { %p162_p1 = scmp.lt.s32.totalorder %s465_s18, 3  ;;  %s174_s22 = sshll.u32 %s538_s2, 4  ;;  %s175_s22 = int_to_ptr.vmem [resolvable:$true] %s174_s22 }
   0x3   : > { %p422_p3 = scmp.eq.s32.totalorder %s391_s19, 0  ;;  %s467_s23 = smov [#allocation2]  }
   0x4   : > { %p163_p2 = pnand %p393_p0, %p162_p1 }
   0x6   : > { %p418_p4 = pneg %p163_p2  ;;  %207 = sbr.rel (%p163_p2) target bundleno = 314 (0x13a), region = 40 }
   0x8   : > { %p419_p5 = pnand %p422_p3, %p418_p4 }
   0xa   : > { %421 = dma.vmem_to_smem (!%p419_p5), %s175_s22, 16, %s467_s23, [#allocation3]  }
   0xb   : > { %460 = dma.done.wait (%p422_p3), [#allocation3], 16  }
   0xc   : > { %462 = vsyncadd (%p422_p3), [#allocation3], 4294967280 }
   0xd   : > { %214 = sfence }
   0xe   : > { %p239_p6 = scmp.lt.s32.totalorder %s391_s19, 1  ;;  %s251_s24 = sld [smem:[#allocation2]]  ;;  %vm273_vm2 = vcmask 261120   ;;  %v468_v22 = vmov 32.0   ;;  %v434_v43 = vld [vmem:[%s539_s3] ss:$0 sm:$0xff] }
   0xf   : > { %s401_s25 = sld [smem:[#allocation2 + $0x1]]  ;;  %436 = vrcp.f32 %v468_v22  ;;  %v435_v45 = vld [vmem:[%s540_s4] ss:$0 sm:$0xff] }
  0x10   : > { %s543_s19 = smov (!%p239_p6, %s391_s19), 1  ;;  %s402_s30 = sld [smem:[#allocation2 + $0x2]] }
  0x11   : > { %s510_s26 = sshll.u32 %s543_s19, 3  ;;  %s403_s6 = sld [smem:[#allocation2 + $0x3]] }
  0x12   : > { %s242_s29 = scalar_lea.vmem %s536_s0, %s510_s26  ;;  %s246_s10 = scalar_lea.vmem %s537_s1, %s510_s26 }
  0x13   : > { %v256_v0 = vld [vmem:[%s242_s29] sm:$0xff]  ;;  %s250_s17 = scalar_lea.vmem %s541_s5, %s510_s26 }
  0x14   : > { %v257_v1 = vstv %s251_s24  ;;  %v271_v18 = vld [vmem:[%s246_s10] sm:$0xff] }
  0x15   : > { %v258_v2 = vmul.f32 %v257_v1, %v256_v0  ;;  %v259_v3 = vstv %s401_s25  ;;  %v437_v23 = vpop.eup %436 }
  0x16   : > { %p254_p7 = scmp.gt.f32.partialorder %s402_s30, 0.5  ;;  %v278_v24 = vmul.f32 32.0, %v437_v23  ;;  %vm282_vm3 = vweird.f32 %v437_v23 }
  0x17   : > { %v260_v4 = vadd.f32 %v259_v3, %v258_v2  ;;  %v265_v15 = vstv %s403_s6 }
  0x18   : > { %s267_s7 = scalar_select %p254_p7, 1, 0  ;;  %v279_v25 = vsub.f32 1.0, %v278_v24 }
  0x19   : > { %v408_v5 = vcvt.f32.s32 %v260_v4  ;;  %v406_v6 = vand.u32 2147483647, %v260_v4  ;;  %v411_v8 = vand.u32 2147483648, %v260_v4 }
  0x1a   : > { %v268_v14 = vstv %s267_s7  ;;  %v280_v26 = vmul.f32 %v437_v23, %v279_v25 }
  0x1b   : > { %v409_v7 = vcvt.s32.f32 %v408_v5  ;;  %vm407_vm0 = vcmp.lt.f32.partialorder %v406_v6, 8388608.0  ;;  %vm269_vm1 = vcmp.eq.s32.totalorder %v268_v14, 1 }
  0x1c   : > { %v281_v27 = vadd.f32 %v437_v23, %v280_v26 }
  0x1d   : > { %v410_v9 = vand.u32 2147483647, %v409_v7 }
  0x1e   : > { %v283_v28 = vsel %vm282_vm3, %v437_v23, %v281_v27 }
  0x1f   : > { %v412_v10 = vor.u32 %v411_v8, %v410_v9 }
  0x21   : > { %v413_v11 = vsel %vm407_vm0, %v412_v10, %v260_v4 }
  0x22   : > { %v262_v12 = vmax.f32 %v413_v11, 0.0 }
  0x24   : > { %v263_v13 = vmin.f32 %v262_v12, 255.0 }
  0x26   : > { %v264_v16 = vsub.f32 %v263_v13, %v259_v3 }
  0x28   : > { %v266_v17 = vmul.f32 %v265_v15, %v264_v16 }
  0x2a   : > { %v270_v19 = vsel %vm269_vm1, %v256_v0, %v266_v17 }
  0x2b   : > { %v272_v20 = vadd.f32 %v271_v18, %v270_v19 }
  0x2d   : > { %v274_v21 = vsel %vm273_vm2, %v272_v20, 0.0 }
  0x2e   : > { %275 = vadd.xlane.f32.xlu0 %v274_v21 }
  0xa1   : > { %v276_v29 = vpop.xlane.xlu0 %275 }
  0xa2   : > { %v284_v30 = vmul.f32 %v283_v28, %v276_v29 }
  0xa4   : > { %v285_v31 = vsub.f32 %v272_v20, %v284_v30 }
  0xa6   : > { %v286_v32 = vmul.f32 %v285_v31, %v285_v31 }
  0xa8   : > { %v287_v33 = vsel %vm273_vm2, %v286_v32, 0.0 }
  0xa9   : > { %288 = vadd.xlane.f32.xlu0 %v287_v33 }
 0x11c   : > { %v289_v34 = vpop.xlane.xlu0 %288 }
 0x11d   : > { %v290_v35 = vmul.f32 %v289_v34, %v283_v28 }
 0x11f   : > { %v291_v36 = vadd.f32 1e-12, %v290_v35 }
 0x121   : > { %438 = vrsqrt.f32 %v291_v36  ;;  %vm298_vm5 = vweird.f32 %v291_v36 }
 0x127   : > { %v439_v37 = vpop.eup %438 }
 0x128   : > { %v293_v38 = vmul.f32 %v439_v37, %v291_v36  ;;  %vm299_vm4 = vweird.f32 %v439_v37 }
 0x129   : > { %vm300_vm6 = vmor %vm298_vm5, %vm299_vm4 }
 0x12a   : > { %v294_v39 = vmul.f32 %v439_v37, %v293_v38 }
 0x12c   : > { %v295_v40 = vmul.f32 0.5, %v294_v39 }
 0x12e   : > { %v296_v41 = vsub.f32 1.5, %v295_v40 }
 0x130   : > { %v297_v42 = vmul.f32 %v439_v37, %v296_v41 }
 0x132   : > { %v301_v44 = vsel %vm300_vm6, %v439_v37, %v297_v42 }
 0x133   : > { %v302_v46 = vmul.f32 %v301_v44, %v285_v31 }
 0x135   : > { %v307_v47 = vmul.f32 %v434_v43, %v302_v46 }
 0x137   : > { %v312_v48 = vadd.f32 %v435_v45, %v307_v47 }
 0x139   : > { %313 = vst.msk [vmem:[%s250_s17] sm:$0xff] %vm273_vm2, %v312_v48 }
 0x13a PF: > { %s16_s18 = sadd.s32 1, %s465_s18  }
 0x13b   : > { %p13_p8 = scmp.ge.s32.totalorder %s16_s18, 4  }
 0x13d   :  { %15 = sbr.rel (!%p13_p8) target bundleno = 1 (0x1), region = 78 }
 0x142   :  { %333 = vsyncpa [#allocation3], 1 }
 0x143   :  { %335 = vsyncpa [#allocation3 + $0x1], 1 }

// kernel: bit_bert_output.2
= control target key start
LH: loop header
LB: loop body
LE: loop exit
PB: predicated region body
PF: predicated region fallthrough
CT: control target
= control target key end

     0   :  { %13 = vsyncpa [#allocation3], 0  ;;  %s693_s24 = smov 0   ;;  %s758_s0 = inlined_call_operand.vmem [shape: f32[16,128], index: 0, kind: input, shape index: {}]   ;;  %s759_s1 = inlined_call_operand.vmem [shape: bf16[128,32], index: 1, kind: input, shape index: {}]   ;;  %s760_s2 = inlined_call_operand.vmem [shape: f32[3], index: 2, kind: input, shape index: {}]   ;;  %s761_s3 = inlined_call_operand.vmem [shape: f32[1,32], index: 3, kind: input, shape index: {}]   ;;  %s762_s4 = inlined_call_operand.vmem [shape: f32[1,32], index: 4, kind: input, shape index: {}]   ;;  %s763_s5 = inlined_call_operand.vmem [shape: f32[16,32], index: 5, kind: output, shape index: {0}]   ;;  %s764_s6 = inlined_call_operand.vmem [shape: f32[2,1,32], index: 6, kind: output, shape index: {1}]   ;;  %s765_s7 = inlined_call_operand.vmem [shape: f32[2,1,32], index: 7, kind: output, shape index: {2}]  }
   0x1 LB: > { %s543_s25 = sadd.s32 4294967295, %s650_s24   ;;  %p545_p0 = scmp.ge.s32.totalorder %s650_s24, 1  ;;  %s650_s24 = sphi %s693_s24, %s19_s24  }
   0x2   : > { %p212_p1 = scmp.lt.s32.totalorder %s650_s24, 3  ;;  %s227_s28 = sshll.u32 %s760_s2, 4  ;;  %s228_s28 = int_to_ptr.vmem [resolvable:$true] %s227_s28 }
   0x3   : > { %p612_p3 = scmp.eq.s32.totalorder %s543_s25, 0  ;;  %s652_s29 = smov [#allocation2]  }
   0x4   : > { %p213_p2 = pnand %p545_p0, %p212_p1 }
   0x6   : > { %p608_p4 = pneg %p213_p2  ;;  %253 = sbr.rel (%p213_p2) target bundleno = 191 (0xbf), region = 40 }
   0x8   : > { %p609_p5 = pnand %p612_p3, %p608_p4 }
   0xa   : > { %611 = dma.vmem_to_smem (!%p609_p5), %s228_s28, 16, %s652_s29, [#allocation3]  }
   0xb   : > { %645 = dma.done.wait (%p612_p3), [#allocation3], 16  }
   0xc   : > { %647 = vsyncadd (%p612_p3), [#allocation3], 4294967280 }
   0xd   : > { %260 = sfence }
   0xe   : > { %v595_v0 = vld [vmem:[%s759_s1 + $0x38] sm:$0xff]  ;;  %p291_p6 = scmp.lt.s32.totalorder %s543_s25, 1  ;;  %s305_s9 = sld [smem:[#allocation2]]  ;;  %v594_v1 = vld [vmem:[%s759_s1 + $0x30] sm:$0xff]  ;;  %v593_v2 = vld [vmem:[%s759_s1 + $0x28] sm:$0xff]  ;;  %vm409_vm2 = vcmask 261120  }
   0xf   : > { %s552_s10 = sld [smem:[#allocation2 + $0x1]]  ;;  %386 = vmatpush.bf16.msra.mxu0 %v595_v0  ;;  %v592_v8 = vld [vmem:[%s759_s1 + $0x20] sm:$0xff]  ;;  %v591_v13 = vld [vmem:[%s759_s1 + $0x18] sm:$0xff]  ;;  %v590_v16 = vld [vmem:[%s759_s1 + $0x10] sm:$0xff]  ;;  %vm418_vm3 = vcmask 253952  }
  0x10   : > { %s767_s25 = smov (!%p291_p6, %s543_s25), 1  ;;  %s553_s14 = sld [smem:[#allocation2 + $0x2]]  ;;  %v589_v20 = vld [vmem:[%s759_s1 + $0x8] sm:$0xff]  ;;  %v588_v22 = vld [vmem:[%s759_s1] sm:$0xff] }
  0x11   : > { %s550_s13 = sshll.u32 %s767_s25, 3  ;;  %v623_v25 = vld [vmem:[%s761_s3] ss:$0 sm:$0xff]  ;;  %s301_s19 = scalar_lea.vmem %s764_s6, %s767_s25 }
  0x12   : > { %s294_s17 = scalar_lea.vmem %s758_s0, %s550_s13  ;;  %v624_v26 = vld [vmem:[%s762_s4] ss:$0 sm:$0xff]  ;;  %s304_s22 = scalar_lea.vmem %s765_s7, %s767_s25 }
  0x13   : > { %387 = vmatpush.bf16.msra.mxu0 %v594_v1  ;;  %v309_v3 = vld [vmem:[%s294_s17] sm:$0xff]  ;;  %s298_s17 = scalar_lea.vmem %s763_s5, %s550_s13 }
  0x14   : > { %v310_v4 = vstv %s305_s9 }
  0x15   : > { %v311_v5 = vmul.f32 %v310_v4, %v309_v3  ;;  %v312_v6 = vstv %s552_s10 }
  0x16   : > { %p308_p7 = scmp.gt.f32.partialorder %s553_s14, 0.5 }
  0x17   : > { %v313_v7 = vadd.f32 %v312_v6, %v311_v5  ;;  %388 = vmatpush.bf16.msra.mxu0 %v593_v2 }
  0x18   : > { %s317_s26 = scalar_select %p308_p7, 1, 0 }
  0x19   : > { %v598_v9 = vcvt.f32.s32 %v313_v7  ;;  %v596_v10 = vand.u32 2147483647, %v313_v7  ;;  %v601_v12 = vand.u32 2147483648, %v313_v7 }
  0x1a   : > { %v318_v19 = vstv %s317_s26 }
  0x1b   : > { %v599_v11 = vcvt.s32.f32 %v598_v9  ;;  %389 = vmatpush.bf16.msra.mxu0 %v592_v8  ;;  %vm597_vm0 = vcmp.lt.f32.partialorder %v596_v10, 8388608.0  ;;  %vm319_vm1 = vcmp.eq.s32.totalorder %v318_v19, 1 }
  0x1d   : > { %v600_v14 = vand.u32 2147483647, %v599_v11 }
  0x1f   : > { %v602_v15 = vor.u32 %v601_v12, %v600_v14  ;;  %390 = vmatpush.bf16.msra.mxu0 %v591_v13 }
  0x21   : > { %v603_v17 = vsel %vm597_vm0, %v602_v15, %v313_v7 }
  0x22   : > { %v315_v18 = vmax.f32 %v603_v17, 0.0 }
  0x23   : > { %391 = vmatpush.bf16.msra.mxu0 %v590_v16 }
  0x24   : > { %v316_v21 = vmin.f32 %v315_v18, 255.0 }
  0x26   : > { %v320_v23 = vsel %vm319_vm1, %v309_v3, %v316_v21 }
  0x27   : > { %392 = vmatpush.bf16.msra.mxu0 %v589_v20  ;;  %v321_v24 = vpack.c.bf16 %v320_v23, %v320_v23 }
  0x2b   : > { %393 = vmatpush.bf16.msra.mxu0 %v588_v22 }
  0x2e   : > { %394 = vmatmul.bf16.vlgmr.msra.gmra.mxu0 %v321_v24 }
  0xab   : > { %v395_v27 = vpop.f32.mrf.mxu0 }
  0xac   : > { %v403_v28 = vmul.f32 %v623_v25, %v395_v27 }
  0xae   : > { %v408_v29 = vadd.f32 %v624_v26, %v403_v28 }
  0xb0   : > { %410 = vst.msk [vmem:[%s298_s17] sm:$0xff] %vm409_vm2, %v408_v29  ;;  %v411_v30 = vsel %vm409_vm2, %v408_v29, inf  ;;  %v420_v31 = vsel %vm409_vm2, %v408_v29, -inf }
  0xb1   : > { %v412_v32 = vrot.slane %v411_v30, 4  ;;  %v421_v33 = vrot.slane %v420_v31, 4 }
  0xb3   : > { %v413_v34 = vmin.f32 %v411_v30, %v412_v32  ;;  %v422_v35 = vmax.f32 %v420_v31, %v421_v33  ;;  %v397_v36 = vpop.f32.mrf.mxu0 }
  0xb5   : > { %v414_v37 = vrot.slane %v413_v34, 2  ;;  %v423_v38 = vrot.slane %v422_v35, 2 }
  0xb7   : > { %v415_v39 = vmin.f32 %v413_v34, %v414_v37  ;;  %v424_v40 = vmax.f32 %v422_v35, %v423_v38 }
  0xb9   : > { %v416_v41 = vrot.slane %v415_v39, 1  ;;  %v425_v42 = vrot.slane %v424_v40, 1 }
  0xbb   : > { %v417_v43 = vmin.f32 %v415_v39, %v416_v41  ;;  %v426_v44 = vmax.f32 %v424_v40, %v425_v42 }
  0xbd   : > { %419 = vst.msk [vmem:[%s301_s19] sm:$0x1] %vm418_vm3, %v417_v43 }
  0xbe   : > { %427 = vst.msk [vmem:[%s304_s22] sm:$0x1] %vm418_vm3, %v426_v44 }
  0xbf PF: > { %s19_s24 = sadd.s32 1, %s650_s24  }
  0xc0   : > { %p16_p8 = scmp.ge.s32.totalorder %s19_s24, 4  }
  0xc2   :  { %18 = sbr.rel (!%p16_p8) target bundleno = 1 (0x1), region = 99 }
  0xc7   :  { %471 = vsyncpa [#allocation3], 1 }
  0xc8   :  { %473 = vsyncpa [#allocation3 + $0x1], 1 }

</bundles_post_ra>
